<compile_context>
chip_gen: v7x
topology: tpu7x:2x2x1
jax: 0.10.0
libtpu: 0.0.40
codegen_flags: <defaults>
</compile_context>

<pallas_src>
import jax
import jax.numpy as jnp
from jax.experimental import pallas as pl
from jax.experimental.pallas import tpu as pltpu

NEG_SLOPE = 0.01                      # torch.nn.LeakyReLU default
DIMS = [1, 16, 32, 64, 128, 256, 2]   # Linear(1,16) ... Linear(256,2)
WIDTHS = (16, 32, 64, 128, 256, 2)    # per-layer output features
W6_NPAD = 128                         # lane-padded N of the last weight (MXU)
CONST_LANES = 256                     # lane width of the packed consts array
TB_MAX = 2048                         # max rows per batch tile


def _round_up(x, m):
    return ((x + m - 1) // m) * m


def _leaky_relu(x):
    # max(x, a*x) == LeakyReLU(x) for 0 < a < 1; 2 VALU ops vs 3 for where().
    return jnp.maximum(x, NEG_SLOPE * x)


def make_generator_kernel(n_splits):
    """Kernel for one batch tile, processed as `n_splits` independent chains."""

    def kernel(x_ref, consts_ref, w2, w3, w4, w5, w6, out_ref):
        # x_ref:      (TB, 1) f32
        # consts_ref: (8, 256) f32; rows 0..5 = b1..b6 (zero padded), row 6 = w1 row
        # w2..w5:     (16,32), (32,64), (64,128), (128,256) bf16 (real K, real N)
        # w6:         (256, 128) bf16 -- N padded 2 -> 128 with zeros
        # out_ref:    (TB, 2) f32
        tb = x_ref.shape[0]
        rows = tb // n_splits

        w1_row = consts_ref[pl.ds(6, 1), : WIDTHS[0]]      # (1, 16) f32
        b1 = consts_ref[pl.ds(0, 1), : WIDTHS[0]]          # (1, 16) f32
        b6 = consts_ref[pl.ds(5, 1), : DIMS[-1]]           # (1, 2)  f32

        for s in range(n_splits):                          # unrolled, static slices
            r0 = s * rows
            x = x_ref[pl.ds(r0, rows), :]                  # (rows, 1) f32

            # Layer 1: Linear(1, 16) as a broadcast mul-add on the VPU (K == 1).
            h = _leaky_relu(x * w1_row + b1)               # (rows, 16) f32

            # Layers 2..5: bf16 MXU matmul (f32 accumulation) + bias + LeakyReLU.
            for layer, w_ref in ((1, w2), (2, w3), (3, w4), (4, w5)):
                h = jnp.dot(h.astype(jnp.bfloat16), w_ref[...],
                            preferred_element_type=jnp.float32)
                h = _leaky_relu(h + consts_ref[pl.ds(layer, 1), : WIDTHS[layer]])

            # Layer 6: Linear(256, 2); only the 2 real lanes are written out.
            h = jnp.dot(h.astype(jnp.bfloat16), w6[...],
                        preferred_element_type=jnp.float32)   # (rows, 128)
            out_ref[pl.ds(r0, rows), :] = (h[:, : DIMS[-1]] + b6).astype(out_ref.dtype)

    return kernel


def init_generator_params(key):
    """PyTorch-style default Linear init, weights stored as (in, out)."""
    params = []
    for i in range(len(DIMS) - 1):
        fan_in, fan_out = DIMS[i], DIMS[i + 1]
        key, kw, kb = jax.random.split(key, 3)
        bound = 1.0 / (fan_in ** 0.5)
        w = jax.random.uniform(kw, (fan_in, fan_out), jnp.float32, -bound, bound)
        b = jax.random.uniform(kb, (fan_out,), jnp.float32, -bound, bound)
        params.append((w, b))
    return params


def pack_generator_params(params):
    """One-time layout conversion (call once, reuse on every forward).

    Weights are expected as (in_features, out_features); transpose PyTorch's
    (out, in) weights before calling.  Returns (consts, w2, w3, w4, w5, w6p)
    with w2..w6 in bfloat16 (MXU operands) and biases / w1 row in float32.
    """
    (w1, b1), (w2, b2), (w3, b3), (w4, b4), (w5, b5), (w6, b6) = params
    consts = jnp.zeros((8, CONST_LANES), jnp.float32)
    for row, b in enumerate((b1, b2, b3, b4, b5, b6)):
        consts = consts.at[row, : b.shape[0]].set(b.astype(jnp.float32))
    consts = consts.at[6, : w1.shape[1]].set(w1[0].astype(jnp.float32))
    w6_p = (jnp.zeros((DIMS[5], W6_NPAD), jnp.float32)
            .at[:, : DIMS[6]].set(w6)).astype(jnp.bfloat16)
    return (consts,
            w2.astype(jnp.bfloat16), w3.astype(jnp.bfloat16),
            w4.astype(jnp.bfloat16), w5.astype(jnp.bfloat16), w6_p)


@jax.jit
def generator_forward(x, consts, w2, w3, w4, w5, w6):
    """x: (B, 1) float32 -> (B, 2) float32. Params are pre-packed (see above)."""
    B = x.shape[0]

    # Batch tile: large tiles amortize grid-step overhead; ~4 KB/row of live
    # VMEM keeps TB=2048 well inside the scoped VMEM of v5e/v6e/v7x.
    TB = min(TB_MAX, _round_up(max(B, 8), 8))
    # v7x has 2 TensorCores: if the batch would fit in a single tile, halve
    # the tile so the "parallel" axis has >=2 grid steps (free on v5e/v6e).
    if B > 8 and _round_up(B, TB) == TB:
        TB = _round_up((TB + 1) // 2, 8)
    B_pad = _round_up(max(B, TB), TB)
    x_p = x if B == B_pad else jnp.pad(x, ((0, B_pad - B), (0, 0)))

    # Split a big tile into two independent half-chains so MXU (matmul) and
    # VALU (bias+LeakyReLU) phases of the two halves can overlap.
    n_splits = 2 if (TB >= 512 and TB % 16 == 0) else 1

    out = pl.pallas_call(
        make_generator_kernel(n_splits),
        out_shape=jax.ShapeDtypeStruct((B_pad, DIMS[-1]), jnp.float32),
        grid_spec=pltpu.PrefetchScalarGridSpec(
            num_scalar_prefetch=0,
            grid=(B_pad // TB,),
            in_specs=[
                pl.BlockSpec((TB, 1), lambda i: (i, 0)),          # x tile
                pl.BlockSpec(consts.shape, lambda i: (0, 0)),     # biases + w1 row
                pl.BlockSpec(w2.shape, lambda i: (0, 0)),         # resident weights
                pl.BlockSpec(w3.shape, lambda i: (0, 0)),
                pl.BlockSpec(w4.shape, lambda i: (0, 0)),
                pl.BlockSpec(w5.shape, lambda i: (0, 0)),
                pl.BlockSpec(w6.shape, lambda i: (0, 0)),
            ],
            out_specs=pl.BlockSpec((TB, DIMS[-1]), lambda i: (i, 0)),
        ),
        compiler_params=pltpu.CompilerParams(
            dimension_semantics=("parallel",)),
    )(x_p, consts, w2, w3, w4, w5, w6)

    return out if B == B_pad else out[:B]


def _reference_forward(x, params):
    h = x
    for i, (w, b) in enumerate(params):
        h = h @ w + b
        if i < len(params) - 1:
            h = jnp.where(h >= 0, h, NEG_SLOPE * h)
    return h


if __name__ == "__main__":
    key = jax.random.PRNGKey(0)
    key, kx = jax.random.split(key)

    params = init_generator_params(key)
    packed = pack_generator_params(params)          # padding / bf16 cast done ONCE

    # bf16 MXU operands -> relaxed tolerance vs the f32 reference.
    ATOL = RTOL = 5e-2

    # Small-batch case (single 8-row tile, grid=(1,)).
    x_small = jax.random.normal(kx, (8, 1), jnp.float32)
    out_small = jax.block_until_ready(generator_forward(x_small, *packed))
    ref_small = _reference_forward(x_small, params)
    assert out_small.shape == (8, 2), out_small.shape
    assert jnp.allclose(out_small, ref_small, atol=ATOL, rtol=RTOL)

    # Multi-tile case: exercises batch tiling + edge-row padding (grid=(2,)).
    key, kx2 = jax.random.split(key)
    x_big = jax.random.normal(kx2, (300, 1), jnp.float32)
    out_big = jax.block_until_ready(generator_forward(x_big, *packed))
    ref_big = _reference_forward(x_big, params)
    assert out_big.shape == (300, 2), out_big.shape
    assert jnp.allclose(out_big, ref_big, atol=ATOL, rtol=RTOL)

    # Larger case: exercises the two-half interleave inside a 1024-row tile.
    key, kx3 = jax.random.split(key)
    x_huge = jax.random.normal(kx3, (2048, 1), jnp.float32)
    out_huge = jax.block_until_ready(generator_forward(x_huge, *packed))
    ref_huge = _reference_forward(x_huge, params)
    assert out_huge.shape == (2048, 2), out_huge.shape
    assert jnp.allclose(out_huge, ref_huge, atol=ATOL, rtol=RTOL)

    print("KERNEL_OK")
</pallas_src>

<mosaic_0001>
module attributes {stable_mosaic.version = 11 : i64} {
  func.func @kernel(%arg0: i32, %arg1: memref<8x1xf32, #tpu.memory_space<vmem>>, %arg2: memref<8x256xf32, #tpu.memory_space<vmem>>, %arg3: memref<16x32xbf16, #tpu.memory_space<vmem>>, %arg4: memref<32x64xbf16, #tpu.memory_space<vmem>>, %arg5: memref<64x128xbf16, #tpu.memory_space<vmem>>, %arg6: memref<128x256xbf16, #tpu.memory_space<vmem>>, %arg7: memref<256x128xbf16, #tpu.memory_space<vmem>>, %arg8: memref<8x2xf32, #tpu.memory_space<vmem>>) attributes {dimension_semantics = [#tpu.dimension_semantics<parallel>], iteration_bounds = array<i64: 1>, scalar_prefetch = 0 : i64, scratch_operands = 0 : i64, tpu.core_type = #tpu.core_type<tc>, window_params = [{transform_indices = @transform_0, window_bounds = array<i64: 8, 1>}, {pipeline_mode = #tpu.pipeline_mode<synchronous>, transform_indices = @transform_1, window_bounds = array<i64: 8, 256>}, {pipeline_mode = #tpu.pipeline_mode<synchronous>, transform_indices = @transform_2, window_bounds = array<i64: 16, 32>}, {pipeline_mode = #tpu.pipeline_mode<synchronous>, transform_indices = @transform_3, window_bounds = array<i64: 32, 64>}, {pipeline_mode = #tpu.pipeline_mode<synchronous>, transform_indices = @transform_4, window_bounds = array<i64: 64, 128>}, {pipeline_mode = #tpu.pipeline_mode<synchronous>, transform_indices = @transform_5, window_bounds = array<i64: 128, 256>}, {pipeline_mode = #tpu.pipeline_mode<synchronous>, transform_indices = @transform_6, window_bounds = array<i64: 256, 128>}, {transform_indices = @transform_7, window_bounds = array<i64: 8, 2>}]} {
    %c6 = arith.constant 6 : index
    %c0 = arith.constant 0 : index
    %0 = vector.load %arg2[%c6, %c0] : memref<8x256xf32, #tpu.memory_space<vmem>>, vector<1x16xf32>
    %c0_0 = arith.constant 0 : index
    %c0_1 = arith.constant 0 : index
    %1 = vector.load %arg2[%c0_0, %c0_1] : memref<8x256xf32, #tpu.memory_space<vmem>>, vector<1x16xf32>
    %c5 = arith.constant 5 : index
    %c0_2 = arith.constant 0 : index
    %2 = vector.load %arg2[%c5, %c0_2] : memref<8x256xf32, #tpu.memory_space<vmem>>, vector<1x2xf32>
    %c0_3 = arith.constant 0 : index
    %c0_4 = arith.constant 0 : index
    %3 = vector.load %arg1[%c0_3, %c0_4] : memref<8x1xf32, #tpu.memory_space<vmem>>, vector<8x1xf32>
    %4 = vector.broadcast %3 : vector<8x1xf32> to vector<8x16xf32>
    %5 = vector.broadcast %0 : vector<1x16xf32> to vector<8x16xf32>
    %6 = arith.mulf %4, %5 : vector<8x16xf32>
    %7 = vector.broadcast %1 : vector<1x16xf32> to vector<8x16xf32>
    %8 = arith.addf %6, %7 : vector<8x16xf32>
    %cst = arith.constant 0.00999999977 : f32
    %9 = vector.broadcast %cst : f32 to vector<8x16xf32>
    %10 = arith.mulf %9, %8 : vector<8x16xf32>
    %11 = arith.maximumf %8, %10 : vector<8x16xf32>
    %12 = arith.truncf %11 : vector<8x16xf32> to vector<8x16xbf16>
    %c0_5 = arith.constant 0 : index
    %c0_6 = arith.constant 0 : index
    %13 = vector.load %arg3[%c0_5, %c0_6] : memref<16x32xbf16, #tpu.memory_space<vmem>>, vector<16x32xbf16>
    %cst_7 = arith.constant dense<0.000000e+00> : vector<8x32xf32>
    %14 = tpu.matmul %12, %13, %cst_7 {dimension_numbers = #tpu.dot_dimension_numbers<[1], [0], [0], [1], [0, 0, 1, 1], [], []>} : vector<8x16xbf16>, vector<16x32xbf16>, vector<8x32xf32> -> vector<8x32xf32>
    %c1 = arith.constant 1 : index
    %c0_8 = arith.constant 0 : index
    %15 = vector.load %arg2[%c1, %c0_8] : memref<8x256xf32, #tpu.memory_space<vmem>>, vector<1x32xf32>
    %16 = vector.broadcast %15 : vector<1x32xf32> to vector<8x32xf32>
    %17 = arith.addf %14, %16 : vector<8x32xf32>
    %cst_9 = arith.constant 0.00999999977 : f32
    %18 = vector.broadcast %cst_9 : f32 to vector<8x32xf32>
    %19 = arith.mulf %18, %17 : vector<8x32xf32>
    %20 = arith.maximumf %17, %19 : vector<8x32xf32>
    %21 = arith.truncf %20 : vector<8x32xf32> to vector<8x32xbf16>
    %c0_10 = arith.constant 0 : index
    %c0_11 = arith.constant 0 : index
    %22 = vector.load %arg4[%c0_10, %c0_11] : memref<32x64xbf16, #tpu.memory_space<vmem>>, vector<32x64xbf16>
    %cst_12 = arith.constant dense<0.000000e+00> : vector<8x64xf32>
    %23 = tpu.matmul %21, %22, %cst_12 {dimension_numbers = #tpu.dot_dimension_numbers<[1], [0], [0], [1], [0, 0, 1, 1], [], []>} : vector<8x32xbf16>, vector<32x64xbf16>, vector<8x64xf32> -> vector<8x64xf32>
    %c2 = arith.constant 2 : index
    %c0_13 = arith.constant 0 : index
    %24 = vector.load %arg2[%c2, %c0_13] : memref<8x256xf32, #tpu.memory_space<vmem>>, vector<1x64xf32>
    %25 = vector.broadcast %24 : vector<1x64xf32> to vector<8x64xf32>
    %26 = arith.addf %23, %25 : vector<8x64xf32>
    %cst_14 = arith.constant 0.00999999977 : f32
    %27 = vector.broadcast %cst_14 : f32 to vector<8x64xf32>
    %28 = arith.mulf %27, %26 : vector<8x64xf32>
    %29 = arith.maximumf %26, %28 : vector<8x64xf32>
    %30 = arith.truncf %29 : vector<8x64xf32> to vector<8x64xbf16>
    %c0_15 = arith.constant 0 : index
    %c0_16 = arith.constant 0 : index
    %31 = vector.load %arg5[%c0_15, %c0_16] : memref<64x128xbf16, #tpu.memory_space<vmem>>, vector<64x128xbf16>
    %cst_17 = arith.constant dense<0.000000e+00> : vector<8x128xf32>
    %32 = tpu.matmul %30, %31, %cst_17 {dimension_numbers = #tpu.dot_dimension_numbers<[1], [0], [0], [1], [0, 0, 1, 1], [], []>} : vector<8x64xbf16>, vector<64x128xbf16>, vector<8x128xf32> -> vector<8x128xf32>
    %c3 = arith.constant 3 : index
    %c0_18 = arith.constant 0 : index
    %33 = vector.load %arg2[%c3, %c0_18] : memref<8x256xf32, #tpu.memory_space<vmem>>, vector<1x128xf32>
    %34 = vector.broadcast %33 : vector<1x128xf32> to vector<8x128xf32>
    %35 = arith.addf %32, %34 : vector<8x128xf32>
    %cst_19 = arith.constant 0.00999999977 : f32
    %36 = vector.broadcast %cst_19 : f32 to vector<8x128xf32>
    %37 = arith.mulf %36, %35 : vector<8x128xf32>
    %38 = arith.maximumf %35, %37 : vector<8x128xf32>
    %39 = arith.truncf %38 : vector<8x128xf32> to vector<8x128xbf16>
    %c0_20 = arith.constant 0 : index
    %c0_21 = arith.constant 0 : index
    %40 = vector.load %arg6[%c0_20, %c0_21] : memref<128x256xbf16, #tpu.memory_space<vmem>>, vector<128x256xbf16>
    %cst_22 = arith.constant dense<0.000000e+00> : vector<8x256xf32>
    %41 = tpu.matmul %39, %40, %cst_22 {dimension_numbers = #tpu.dot_dimension_numbers<[1], [0], [0], [1], [0, 0, 1, 1], [], []>} : vector<8x128xbf16>, vector<128x256xbf16>, vector<8x256xf32> -> vector<8x256xf32>
    %c4 = arith.constant 4 : index
    %c0_23 = arith.constant 0 : index
    %42 = vector.load %arg2[%c4, %c0_23] : memref<8x256xf32, #tpu.memory_space<vmem>>, vector<1x256xf32>
    %43 = vector.broadcast %42 : vector<1x256xf32> to vector<8x256xf32>
    %44 = arith.addf %41, %43 : vector<8x256xf32>
    %cst_24 = arith.constant 0.00999999977 : f32
    %45 = vector.broadcast %cst_24 : f32 to vector<8x256xf32>
    %46 = arith.mulf %45, %44 : vector<8x256xf32>
    %47 = arith.maximumf %44, %46 : vector<8x256xf32>
    %48 = arith.truncf %47 : vector<8x256xf32> to vector<8x256xbf16>
    %c0_25 = arith.constant 0 : index
    %c0_26 = arith.constant 0 : index
    %49 = vector.load %arg7[%c0_25, %c0_26] : memref<256x128xbf16, #tpu.memory_space<vmem>>, vector<256x128xbf16>
    %cst_27 = arith.constant dense<0.000000e+00> : vector<8x128xf32>
    %50 = tpu.matmul %48, %49, %cst_27 {dimension_numbers = #tpu.dot_dimension_numbers<[1], [0], [0], [1], [0, 0, 1, 1], [], []>} : vector<8x256xbf16>, vector<256x128xbf16>, vector<8x128xf32> -> vector<8x128xf32>
    %51 = vector.extract_strided_slice %50 {offsets = [0, 0], sizes = [8, 2], strides = [1, 1]} : vector<8x128xf32> to vector<8x2xf32>
    %52 = vector.broadcast %2 : vector<1x2xf32> to vector<8x2xf32>
    %53 = arith.addf %51, %52 : vector<8x2xf32>
    %c0_28 = arith.constant 0 : index
    %c0_29 = arith.constant 0 : index
    %54 = vector.load %arg8[%c0_28, %c0_29] : memref<8x2xf32, #tpu.memory_space<vmem>>, vector<8x2xf32>
    tpu.vector_store %arg8[%c0_28, %c0_29], %53 {strides = array<i32>} : memref<8x2xf32, #tpu.memory_space<vmem>>, vector<8x2xf32>,
    return
  }
  func.func @transform_0(%arg0: i32) -> (i32, i32) {
    %c0_i32 = arith.constant 0 : i32
    %c0_i32_0 = arith.constant 0 : i32
    return %arg0, %c0_i32 : i32, i32
  }
  func.func @transform_1(%arg0: i32) -> (i32, i32) {
    %c0_i32 = arith.constant 0 : i32
    %c0_i32_0 = arith.constant 0 : i32
    %c0_i32_1 = arith.constant 0 : i32
    return %c0_i32, %c0_i32_0 : i32, i32
  }
  func.func @transform_2(%arg0: i32) -> (i32, i32) {
    %c0_i32 = arith.constant 0 : i32
    %c0_i32_0 = arith.constant 0 : i32
    %c0_i32_1 = arith.constant 0 : i32
    return %c0_i32, %c0_i32_0 : i32, i32
  }
  func.func @transform_3(%arg0: i32) -> (i32, i32) {
    %c0_i32 = arith.constant 0 : i32
    %c0_i32_0 = arith.constant 0 : i32
    %c0_i32_1 = arith.constant 0 : i32
    return %c0_i32, %c0_i32_0 : i32, i32
  }
  func.func @transform_4(%arg0: i32) -> (i32, i32) {
    %c0_i32 = arith.constant 0 : i32
    %c0_i32_0 = arith.constant 0 : i32
    %c0_i32_1 = arith.constant 0 : i32
    return %c0_i32, %c0_i32_0 : i32, i32
  }
  func.func @transform_5(%arg0: i32) -> (i32, i32) {
    %c0_i32 = arith.constant 0 : i32
    %c0_i32_0 = arith.constant 0 : i32
    %c0_i32_1 = arith.constant 0 : i32
    return %c0_i32, %c0_i32_0 : i32, i32
  }
  func.func @transform_6(%arg0: i32) -> (i32, i32) {
    %c0_i32 = arith.constant 0 : i32
    %c0_i32_0 = arith.constant 0 : i32
    %c0_i32_1 = arith.constant 0 : i32
    return %c0_i32, %c0_i32_0 : i32, i32
  }
  func.func @transform_7(%arg0: i32) -> (i32, i32) {
    %c0_i32 = arith.constant 0 : i32
    %c0_i32_0 = arith.constant 0 : i32
    return %arg0, %c0_i32 : i32, i32
  }
}

</mosaic_0001>

<bundles_post_ra>
// kernel: generator_forward.1
= control target key start
LH: loop header
LB: loop body
LE: loop exit
PB: predicated region body
PF: predicated region fallthrough
CT: control target
= control target key end

     0   :  { %12 = vsyncpa [#allocation3], 0  ;;  %s1057_s0 = inlined_call_operand.vmem [shape: f32[8,1], index: 0, kind: input, shape index: {}]   ;;  %s1058_s1 = inlined_call_operand.hbm [shape: f32[8,256], index: 1, kind: input, shape index: {}]   ;;  %s1059_s2 = inlined_call_operand.hbm [shape: bf16[16,32], index: 2, kind: input, shape index: {}]   ;;  %s1060_s3 = inlined_call_operand.vmem [shape: bf16[32,64], index: 3, kind: input, shape index: {}]   ;;  %s1061_s4 = inlined_call_operand.hbm [shape: bf16[64,128], index: 4, kind: input, shape index: {}]   ;;  %s1062_s5 = inlined_call_operand.hbm [shape: bf16[128,256], index: 5, kind: input, shape index: {}]   ;;  %s1063_s6 = inlined_call_operand.hbm [shape: bf16[256,128], index: 6, kind: input, shape index: {}]   ;;  %s1064_s7 = inlined_call_operand.vmem [shape: f32[8,2], index: 7, kind: output, shape index: {}]  }
   0x1   :  { %13 = vsyncpa [#allocation5], 0 }
   0x2   :  { %14 = vsyncpa [#allocation8], 0  ;;  %s917_s24 = smov [#allocation4]   ;;  %s801_s28 = scalar_lea.hbm %s1059_s2, 128 }
   0x3   :  { %s32_s25 = sshll.u32 %s917_s24, 4  ;;  %p802_p0 = scmp.ne.s32.totalorder %s1059_s2, %s801_s28  ;;  %s33_s25 = int_to_ptr.vmem [resolvable:$true] %s32_s25 }
   0x4   :  { %p805_p1 = scmp.lt.u32.totalorder %s801_s28, %s1059_s2 }
   0x6   :  { %p807_p2 = pnand %p805_p1, %p802_p0 }
   0x8   :  { %810 = shalt.err (!%p807_p2)
}
   0x9   :  { %s811_s10 = scalar_lea.vmem %s33_s25, 128  ;;  %p816_p4 = scmp.lt.s32.totalorder %s33_s25, %s33_s25 }
   0xa   :  { %p812_p3 = scmp.ne.s32.totalorder %s33_s25, %s811_s10  ;;  %p817_p5 = scmp.lt.s32.totalorder %s811_s10, %s811_s10 }
   0xc   :  { %p818_p6 = por %p817_p5, %p816_p4 }
   0xe   :  { %p819_p7 = pnand %p818_p6, %p812_p3 }
  0x10   :  { %822 = shalt.err (!%p819_p7)
}
  0x11   :  { %s918_s11 = smov 64   ;;  %s919_s12 = smov 4  }
  0x12   :  { %38 = dma.hbm_to_vmem [thread:$0]  %s1059_s2, 128, %s33_s25, [#allocation5], %s918_s11, %s918_s11, %s919_s12  }
  0x13   :  { %s920_s15 = smov [#allocation7]   ;;  %s823_s19 = scalar_lea.hbm %s1062_s5, 2048 }
  0x14   :  { %s58_s16 = sshll.u32 %s920_s15, 4  ;;  %p824_p8 = scmp.ne.s32.totalorder %s1062_s5, %s823_s19  ;;  %s59_s16 = int_to_ptr.vmem [resolvable:$true] %s58_s16 }
  0x15   :  { %p827_p9 = scmp.lt.u32.totalorder %s823_s19, %s1062_s5 }
  0x17   :  { %p829_p10 = pnand %p827_p9, %p824_p8 }
  0x19   :  { %832 = shalt.err (!%p829_p10)
}
  0x1a   :  { %s833_s24 = scalar_lea.vmem %s59_s16, 2048  ;;  %p838_p12 = scmp.lt.s32.totalorder %s59_s16, %s59_s16 }
  0x1b   :  { %p834_p11 = scmp.ne.s32.totalorder %s59_s16, %s833_s24  ;;  %p839_p13 = scmp.lt.s32.totalorder %s833_s24, %s833_s24 }
  0x1d   :  { %p840_p0 = por %p839_p13, %p838_p12 }
  0x1f   :  { %p841_p1 = pnand %p840_p0, %p834_p11 }
  0x21   :  { %844 = shalt.err (!%p841_p1)
}
  0x22   :  { %s921_s2 = smov 128   ;;  %s922_s25 = smov 8  }
  0x23   :  { %64 = dma.hbm_to_vmem [thread:$0]  %s1062_s5, 2048, %s59_s16, [#allocation8], %s921_s2, %s921_s2, %s922_s25  }
  0x24   :  { %s923_s28 = smov [#allocation2]   ;;  %s924_s30 = smov [#allocation6]  }
  0x25   :  { %s23_s29 = sshll.u32 %s923_s28, 4  ;;  %s46_s8 = sshll.u32 %s924_s30, 4  ;;  %s24_s29 = int_to_ptr.vmem [resolvable:$true] %s23_s29  ;;  %s996_s8 = int_to_ptr.vmem [resolvable:$true] %s46_s8 }
  0x26   :  { %s845_s13 = scalar_lea.hbm %s1058_s1, 256 }
  0x27   :  { %p846_p2 = scmp.ne.s32.totalorder %s1058_s1, %s845_s13  ;;  %p849_p3 = scmp.lt.u32.totalorder %s845_s13, %s1058_s1 }
  0x29   :  { %p851_p4 = pnand %p849_p3, %p846_p2 }
  0x2b   :  { %854 = shalt.err (!%p851_p4)
}
  0x2c   :  { %s855_s5 = scalar_lea.vmem %s24_s29, 256  ;;  %p860_p6 = scmp.lt.s32.totalorder %s24_s29, %s24_s29 }
  0x2d   :  { %p856_p5 = scmp.ne.s32.totalorder %s24_s29, %s855_s5  ;;  %p861_p7 = scmp.lt.s32.totalorder %s855_s5, %s855_s5 }
  0x2f   :  { %p862_p8 = por %p861_p7, %p860_p6 }
  0x31   :  { %p863_p9 = pnand %p862_p8, %p856_p5 }
  0x33   :  { %866 = shalt.err (!%p863_p9)
}
  0x34   :  { %26 = dma.hbm_to_vmem [thread:$0]  %s1058_s1, 256, %s24_s29, [#allocation3]  }
  0x35   :  { %s867_s22 = scalar_lea.hbm %s1061_s4, 512 }
  0x36   :  { %p868_p10 = scmp.ne.s32.totalorder %s1061_s4, %s867_s22  ;;  %p871_p11 = scmp.lt.u32.totalorder %s867_s22, %s1061_s4 }
  0x38   :  { %p873_p12 = pnand %p871_p11, %p868_p10 }
  0x3a   :  { %876 = shalt.err (!%p873_p12)
}
  0x3b   :  { %s877_s26 = scalar_lea.vmem %s996_s8, 512  ;;  %p882_p0 = scmp.lt.s32.totalorder %s996_s8, %s996_s8 }
  0x3c   :  { %p878_p13 = scmp.ne.s32.totalorder %s996_s8, %s877_s26  ;;  %p883_p1 = scmp.lt.s32.totalorder %s877_s26, %s877_s26 }
  0x3e   :  { %p884_p2 = por %p883_p1, %p882_p0 }
  0x40   :  { %p885_p3 = pnand %p884_p2, %p878_p13 }
  0x42   :  { %888 = shalt.err (!%p885_p3)
}
  0x43   :  { %52 = dma.hbm_to_vmem [thread:$0]  %s1061_s4, 512, %s996_s8, [#allocation5], %s918_s11, %s918_s11, %s919_s12  }
  0x44   :  { %s925_s28 = smov [#allocation9]   ;;  %s889_s10 = scalar_lea.hbm %s1063_s6, 2048 }
  0x45   :  { %s70_s29 = sshll.u32 %s925_s28, 4  ;;  %p890_p4 = scmp.ne.s32.totalorder %s1063_s6, %s889_s10  ;;  %s71_s29 = int_to_ptr.vmem [resolvable:$true] %s70_s29 }
  0x46   :  { %p893_p5 = scmp.lt.u32.totalorder %s889_s10, %s1063_s6 }
  0x48   :  { %p895_p6 = pnand %p893_p5, %p890_p4 }
  0x4a   :  { %898 = shalt.err (!%p895_p6)
}
  0x4b   :  { %s899_s18 = scalar_lea.vmem %s71_s29, 2048  ;;  %p904_p8 = scmp.lt.s32.totalorder %s71_s29, %s71_s29 }
  0x4c   :  { %p900_p7 = scmp.ne.s32.totalorder %s71_s29, %s899_s18  ;;  %p905_p9 = scmp.lt.s32.totalorder %s899_s18, %s899_s18 }
  0x4e   :  { %p906_p10 = por %p905_p9, %p904_p8 }
  0x50   :  { %p907_p11 = pnand %p906_p10, %p900_p7 }
  0x52   :  { %910 = shalt.err (!%p907_p11)
}
  0x53   :  { %76 = dma.hbm_to_vmem [thread:$0]  %s1063_s6, 2048, %s71_s29, [#allocation8], %s918_s11, %s918_s11, %s919_s12  }
  0x54   :  { %911 = dma.done.wait [#allocation3], 256  }
  0x55   :  { %912 = vsyncadd [#allocation3], 4294967040 }
  0x56   :  { %913 = dma.done.wait [#allocation5], 640  }
  0x57   :  { %914 = vsyncadd [#allocation5], 4294966656 }
  0x58   :  { %915 = dma.done.wait [#allocation8], 4096  }
  0x59   :  { %916 = vsyncadd [#allocation8], 4294963200  ;;  %v926_v0 = vmov 0   ;;  %v96_v1 = vld [vmem:[%s1057_s0] sm:$0xff]  ;;  %v927_v3 = vmov 0.0   ;;  %vm928_vm0 = vmmov 0  }
  0x5a   :  { %753 = vset.pattern.permute.xlu0 %v926_v0  ;;  %v754_v2 = vld [vmem:[#allocation4] sm:$0xff]   ;;  %715 = vmatprep.subr.bf16.mxu1 %v927_v3  ;;  %v93_v4 = vld [vmem:[#allocation2 + $0x6] ss:$0 sm:$0xff]  ;;  %v94_v6 = vld [vmem:[#allocation2] ss:$0 sm:$0xff]  ;;  %vm116_vm1 = vcmask 130048  }
  0x5b   :  { %99 = vperm.xlu0 %753, %v96_v1   ;;  %729 = vmatprep.subr.bf16.mxu0 %v927_v3  ;;  %v755_v12 = vld [vmem:[%s1060_s3] sm:$0xff]   ;;  %v756_v13 = vld [vmem:[%s1060_s3 + $0x8] sm:$0xff]   ;;  %v758_v15 = vld [vmem:[#allocation6 + $0x8] sm:$0xff]   ;;  %vm180_vm2 = vcmask 261120   ;;  %vm260_vm3 = vcmask 523264   ;;  %vm632_vm4 = vcmask 15360  }
  0x5c   :  { %716 = vmatpush3.bf16.msra.mxu1 %v754_v2  ;;  %717 = vmatprep.mubr.msk.bf16.mxu1 %vm928_vm0, %v927_v3  ;;  %v757_v14 = vld [vmem:[#allocation6] sm:$0xff]   ;;  %v109_v16 = vld [vmem:[#allocation2 + $0x1] ss:$0 sm:$0xff]  ;;  %v759_v25 = vld [vmem:[#allocation6 + $0x10] sm:$0xff]  }
  0x5d   :  { %721 = vmatprep.subr.bf16.mxu1 %v927_v3  ;;  %737 = vmatprep.mubr.msk.bf16.mxu0 %vm928_vm0, %v927_v3  ;;  %v760_v26 = vld [vmem:[#allocation6 + $0x18] sm:$0xff]   ;;  %v761_v27 = vld [vmem:[#allocation7] ss:$8 sps:$4 sm:$0xff]   ;;  %v763_v28 = vld [vmem:[#allocation7 + $0x4] ss:$8 sps:$4 sm:$0xff]  }
  0x5e   :  { %730 = vmatpush3.bf16.msra.mxu0 %v757_v14  ;;  %v766_v29 = vld [vmem:[#allocation7 + $0x14] ss:$8 sps:$4 sm:$0xff]   ;;  %v764_v30 = vld [vmem:[#allocation7 + $0x10] ss:$8 sps:$4 sm:$0xff]   ;;  %v769_v31 = vld [vmem:[#allocation7 + $0x24] ss:$8 sps:$4 sm:$0xff]  }
  0x5f   :  { %731 = vmatprep.subr.bf16.mxu0 %v927_v3  ;;  %v767_v32 = vld [vmem:[#allocation7 + $0x20] ss:$8 sps:$4 sm:$0xff]   ;;  %v772_v33 = vld [vmem:[#allocation7 + $0x34] ss:$8 sps:$4 sm:$0xff]   ;;  %v770_v34 = vld [vmem:[#allocation7 + $0x30] ss:$8 sps:$4 sm:$0xff]  }
  0x60   :  { %v775_v35 = vld [vmem:[#allocation7 + $0x44] ss:$8 sps:$4 sm:$0xff]   ;;  %v773_v36 = vld [vmem:[#allocation7 + $0x40] ss:$8 sps:$4 sm:$0xff]   ;;  %v778_v37 = vld [vmem:[#allocation7 + $0x54] ss:$8 sps:$4 sm:$0xff]  }
  0x61   :  { %v776_v38 = vld [vmem:[#allocation7 + $0x50] ss:$8 sps:$4 sm:$0xff]   ;;  %v167_v39 = vld [vmem:[#allocation2 + $0x2] ss:$0 sm:$0xff]  ;;  %v781_v48 = vld [vmem:[#allocation7 + $0x64] ss:$8 sps:$4 sm:$0xff]  }
  0x62   :  { %732 = vmatpush3.bf16.msra.mxu0 %v758_v15  ;;  %v779_v49 = vld [vmem:[#allocation7 + $0x60] ss:$8 sps:$4 sm:$0xff]   ;;  %v784_v50 = vld [vmem:[#allocation7 + $0x74] ss:$8 sps:$4 sm:$0xff]   ;;  %v782_v51 = vld [vmem:[#allocation7 + $0x70] ss:$8 sps:$4 sm:$0xff]  }
  0x63   :  { %733 = vmatprep.subr.bf16.mxu0 %v927_v3  ;;  %v785_v52 = vld [vmem:[#allocation9 + $0x40] sm:$0xff]   ;;  %v787_v54 = vld [vmem:[#allocation9 + $0x48] sm:$0xff]   ;;  %v789_v56 = vld [vmem:[#allocation9 + $0x50] sm:$0xff]  }
  0x64   :  { %v786_v53 = vld [vmem:[#allocation9] sm:$0xff]   ;;  %v788_v55 = vld [vmem:[#allocation9 + $0x8] sm:$0xff]   ;;  %v790_v57 = vld [vmem:[#allocation9 + $0x10] sm:$0xff]  }
  0x65   :  { %v791_v58 = vld [vmem:[#allocation9 + $0x58] sm:$0xff]   ;;  %v793_v60 = vld [vmem:[#allocation9 + $0x60] sm:$0xff]   ;;  %v795_v62 = vld [vmem:[#allocation9 + $0x68] sm:$0xff]  }
  0x66   :  { %734 = vmatpush3.bf16.msra.mxu0 %v759_v25  ;;  %v792_v59 = vld [vmem:[#allocation9 + $0x18] sm:$0xff]   ;;  %v794_v61 = vld [vmem:[#allocation9 + $0x20] sm:$0xff]   ;;  %v235_v63 = vld [vmem:[#allocation2 + $0x3] ss:$0 sm:$0xff] }
  0x67   :  { %735 = vmatprep.subr.bf16.mxu0 %v927_v3 }
  0x6a   :  { %736 = vmatpush3.bf16.msra.mxu0 %v760_v26 }
  0x6b   :  { %693 = vmatprep.subr.bf16.mxu0 %v785_v52 }
  0xda   :  { %v100_v5 = vpop.permute.xlu0 %99 }
  0xdb   :  { %v102_v7 = vmul.f32 %v100_v5, %v93_v4 }
  0xdd   :  { %v103_v8 = vadd.f32 %v102_v7, %v94_v6 }
  0xdf   :  { %v104_v9 = vmul.f32 0.01, %v103_v8 }
  0xe1   :  { %v105_v10 = vmax.f32 %v103_v8, %v104_v9  ;;  %v796_v8 = vld [vmem:[#allocation9 + $0x28] sm:$0xff]   ;;  %v797_v9 = vld [vmem:[#allocation9 + $0x70] sm:$0xff]  }
  0xe3   :  { %v106_v11 = vpack.c.bf16 %v105_v10, %v105_v10  ;;  %v798_v10 = vld [vmem:[#allocation9 + $0x30] sm:$0xff]  }
  0xe5   :  { %718 = vmatmul.mubr.msk.bf16.vlgmr.msra.gmra.mrb[0].mxu1 %vm116_vm1, %v106_v11  ;;  %v799_v11 = vld [vmem:[#allocation9 + $0x78] sm:$0xff]  }
  0xe6   :  { %725 = vmatprep.mubr.msk.bf16.mxu1 %vm928_vm0, %v927_v3  ;;  %722 = vmatpush3.bf16.msra.mxu1 %v755_v12  ;;  %v800_v12 = vld [vmem:[#allocation9 + $0x38] sm:$0xff]  }
  0xe7   :  { %723 = vmatprep.subr.bf16.mxu1 %v927_v3 }
  0xea   :  { %724 = vmatpush3.bf16.msra.mxu1 %v756_v13  ;;  %v326_v13 = vlaneseq }
  0xeb   :  { %416 = vmatprep.subr.bf16.mxu1 %v763_v28 }
  0xec   :  { %v327_v14 = vshrl.u32 %v326_v13, 7 }
  0xee   :  { %v328_v15 = vsub.s32 0, %v327_v14 }
 0x1b8   :  { %v154_v17 = vpop.f32.mrb[0].mxu1 }
 0x1b9   :  { %v155_v18 = vadd.f32 %v154_v17, %v109_v16  ;;  %v719_v19 = vpop.f32.mrb[1].mxu1  ;;  %v324_v16 = vld [vmem:[#allocation2 + $0x4] ss:$8 sm:$0x3]  ;;  %v332_v17 = vsub.s32 1, %v327_v14 }
 0x1ba   :  { %v157_v20 = vpop.f32.mrb[2].mxu1 }
 0x1bb   :  { %v160_v21 = vmul.f32 0.01, %v155_v18  ;;  %v720_v22 = vpop.f32.mrb[3].mxu1  ;;  %v333_v19 = vrot.slane %v324_v16, %v332_v17 }
 0x1bd   :  { %v161_v23 = vmax.f32 %v155_v18, %v160_v21  ;;  %v329_v18 = vrot.slane %v324_v16, %v328_v15 }
 0x1bf   :  { %v162_v24 = vpack.c.bf16 %v161_v23, %v161_v23 }
 0x1c1   :  { %726 = vmatmul.mubr.msk.bf16.vlgmr.msra.gmra.mrb[4].mxu1 %vm180_vm2, %v162_v24 }
 0x1c2   :  { %448 = vmatprep.mubr.bf16.mxu1 %v926_v0  ;;  %417 = vmatpush1.bf16.msra.mxu1 %v761_v27 }
 0x1c3   :  { %418 = vmatprep.subr.bf16.mxu1 %v766_v29 }
 0x1c6   :  { %419 = vmatpush1.bf16.msra.mxu1 %v764_v30 }
 0x1c7   :  { %420 = vmatprep.subr.bf16.mxu1 %v769_v31 }
 0x1ca   :  { %421 = vmatpush1.bf16.msra.mxu1 %v767_v32 }
 0x1cb   :  { %422 = vmatprep.subr.bf16.mxu1 %v772_v33  ;;  %v95_v33 = vld [vmem:[#allocation2 + $0x5] ss:$0 sm:$0xff] }
 0x1ce   :  { %423 = vmatpush1.bf16.msra.mxu1 %v770_v34 }
 0x1cf   :  { %424 = vmatprep.subr.bf16.mxu1 %v775_v35 }
 0x1d2   :  { %425 = vmatpush1.bf16.msra.mxu1 %v773_v36 }
 0x1d3   :  { %426 = vmatprep.subr.bf16.mxu1 %v778_v37 }
 0x1d6   :  { %427 = vmatpush1.bf16.msra.mxu1 %v776_v38 }
 0x1d7   :  { %428 = vmatprep.subr.bf16.mxu1 %v781_v48 }
 0x1da   :  { %429 = vmatpush1.bf16.msra.mxu1 %v779_v49 }
 0x1db   :  { %430 = vmatprep.subr.bf16.mxu1 %v784_v50 }
 0x1de   :  { %431 = vmatpush1.bf16.msra.mxu1 %v782_v51 }
 0x294   :  { %v218_v40 = vpop.f32.mrb[4].mxu1 }
 0x295   :  { %v219_v41 = vadd.f32 %v218_v40, %v167_v39  ;;  %v727_v42 = vpop.f32.mrb[5].mxu1 }
 0x296   :  { %v221_v43 = vpop.f32.mrb[6].mxu1 }
 0x297   :  { %v224_v44 = vmul.f32 0.01, %v219_v41  ;;  %v728_v45 = vpop.f32.mrb[7].mxu1 }
 0x299   :  { %v225_v46 = vmax.f32 %v219_v41, %v224_v44 }
 0x29b   :  { %v226_v47 = vpack.c.bf16 %v225_v46, %v225_v46 }
 0x29d   :  { %738 = vmatmul.mubr.msk.bf16.vlgmr.msra.gmra.mrb[0].mxu0 %vm260_vm3, %v226_v47 }
 0x29e   :  { %694 = vmatpush3.bf16.msra.mxu0 %v786_v53 }
 0x29f   :  { %695 = vmatprep.subr.bf16.mxu0 %v787_v54 }
 0x2a2   :  { %696 = vmatpush3.bf16.msra.mxu0 %v788_v55 }
 0x2a3   :  { %697 = vmatprep.subr.bf16.mxu0 %v789_v56 }
 0x2a6   :  { %698 = vmatpush3.bf16.msra.mxu0 %v790_v57 }
 0x2a7   :  { %699 = vmatprep.subr.bf16.mxu0 %v791_v58 }
 0x2aa   :  { %700 = vmatpush3.bf16.msra.mxu0 %v792_v59 }
 0x2ab   :  { %701 = vmatprep.subr.bf16.mxu0 %v793_v60 }
 0x2ae   :  { %702 = vmatpush3.bf16.msra.mxu0 %v794_v61 }
 0x2af   :  { %703 = vmatprep.subr.bf16.mxu0 %v795_v62 }
 0x2b2   :  { %704 = vmatpush3.bf16.msra.mxu0 %v796_v8 }
 0x2b3   :  { %705 = vmatprep.subr.bf16.mxu0 %v797_v9 }
 0x2b6   :  { %706 = vmatpush3.bf16.msra.mxu0 %v798_v10 }
 0x2b7   :  { %707 = vmatprep.subr.bf16.mxu0 %v799_v11 }
 0x2ba   :  { %708 = vmatpush3.bf16.msra.mxu0 %v800_v12 }
 0x370   :  { %v298_v0 = vpop.f32.mrb[0].mxu0 }
 0x371   :  { %v299_v1 = vadd.f32 %v298_v0, %v235_v63  ;;  %v739_v2 = vpop.f32.mrb[1].mxu0 }
 0x372   :  { %v301_v3 = vpop.f32.mrb[2].mxu0 }
 0x373   :  { %v304_v4 = vmul.f32 0.01, %v299_v1  ;;  %v740_v5 = vpop.f32.mrb[3].mxu0 }
 0x375   :  { %v305_v6 = vmax.f32 %v299_v1, %v304_v4 }
 0x377   :  { %v306_v7 = vpack.c.bf16 %v305_v6, %v305_v6 }
 0x379   :  { %449 = vmatmul.mubr.bf16.vlgmr.msra.gmra.mrb[8].mxu1 %v306_v7 }
 0x44c   :  { %v450_v20 = vpop.f32.mrb[8].mxu1 }
 0x44d   :  { %v451_v21 = vadd.f32 %v450_v20, %v329_v18  ;;  %v452_v22 = vpop.f32.mrb[9].mxu1 }
 0x44e   :  { %v453_v23 = vadd.f32 %v452_v22, %v333_v19  ;;  %v454_v24 = vpop.f32.mrb[10].mxu1 }
 0x44f   :  { %v457_v25 = vmul.f32 0.01, %v451_v21  ;;  %v455_v26 = vpop.f32.mrb[11].mxu1 }
 0x450   :  { %v458_v27 = vmul.f32 0.01, %v453_v23 }
 0x451   :  { %v459_v28 = vmax.f32 %v451_v21, %v457_v25 }
 0x452   :  { %v460_v29 = vmax.f32 %v453_v23, %v458_v27 }
 0x453   :  { %v461_v31 = vpack.c.bf16 %v459_v28, %v459_v28 }
 0x454   :  { %v462_v30 = vpack.c.bf16 %v460_v29, %v460_v29 }
 0x456   :  { %623 = vmatprep.mubr.bf16.mxu0 %v462_v30 }
 0x457   :  { %624 = vmatmul.mubr.bf16.vlgmr.msra.gmra.mrb[4].mxu0 %v461_v31 }
 0x52a   :  { %v709_v32 = vpop.f32.mrb[4].mxu0 }
 0x52b   :  { %v710_v34 = vpop.f32.mrb[5].mxu0 }
 0x52c   :  { %v711_v35 = vadd.f32 %v710_v34, %v709_v32  ;;  %v712_v36 = vpop.f32.mrb[6].mxu0 }
 0x52d   :  { %v713_v37 = vpop.f32.mrb[7].mxu0 }
 0x52e   :  { %v631_v38 = vadd.f32 %v711_v35, %v95_v33 }
 0x530   :  { %633 = vst.msk [vmem:[%s1064_s7] sm:$0xff] %vm632_vm4, %v631_v38 }
 0x531   :  { %638 = vsyncpa [#allocation3], 1 }
 0x532   :  { %639 = vsyncpa [#allocation5], 1 }
 0x533   :  { %640 = vsyncpa [#allocation8], 1 }

</bundles_post_ra>
